<compile_context>
chip_gen: v7x
topology: tpu7x:2x2x1
jax: 0.10.0
libtpu: 0.0.40
codegen_flags: <defaults>
</compile_context>

<pallas_src>
import numpy as np
import jax
import jax.numpy as jnp
from jax.experimental import pallas as pl
from jax.experimental.pallas import tpu as pltpu

VOCAB = 100          # surrogate-BERT vocabulary size
NUM_CLASSES = 3
FC1_WIDTH = 192      # true fc1 width in the module
FC1_PAD = 256        # fc1 zero-padded to two lane-dense 128-wide panels
OUT_LANES = 128      # lane-dense padded logits width
LANES = 128          # slab lane width (nothing wasted)
TB_MAX = 256         # max batch tile (fills MXU rows on v6e/v7x)

# rows of the small f32 bias slab
B_GATE, B_FC1A, B_FC1B, B_FC2 = 0, 1, 2, 3
BIAS_ROWS = 8


def _rup(x, m):
    return (x + m - 1) // m * m


class SlabLayout:
    """Static row offsets of every weight inside the packed bf16 slab (128 lanes)."""

    def __init__(self, input_size, hidden_size):
        IN, H = input_size, hidden_size
        assert 8 * H <= LANES, "fused gate width must fit one 128-lane panel"
        assert IN <= LANES
        assert FC1_PAD == 2 * LANES
        self.pw = 0                                   # [IN, IN]   pooler dense
        self.wih_f = self.pw + _rup(IN, 8)            # [IN, 8H]   fwd input->gates (fused cols)
        self.wih_b = self.wih_f + _rup(IN, 8)         # [IN, 8H]   bwd input->gates (fused cols)
        self.whh = self.wih_b + _rup(IN, 8)           # [2H, 8H]   block-diag hidden->gates
        self.w1a = self.whh + _rup(2 * H, 8)          # [2H, 128]  fc1 cols   0:128
        self.w1b = self.w1a + _rup(2 * H, 8)          # [2H, 128]  fc1 cols 128:256
        self.w2 = self.w1b + _rup(2 * H, 8)           # [256, 128] fc2 (rows = padded fc1)
        self.rows = _rup(self.w2 + FC1_PAD, 8)
        self.lanes = LANES


# ----------------------------- Pallas kernel ------------------------------ #

def _make_kernel(layout, L, n_steps, input_size, hidden_size):
    IN, H = input_size, hidden_size
    G = 8 * H                    # fused gate width (both directions)
    R = layout
    f32, bf16 = jnp.float32, jnp.bfloat16

    def kernel(pooled_ref, w_ref, b_ref, out_ref):
        # pooled_ref: [L, TB, IN]  bf16  mean-pooled surrogate-BERT embeddings
        # w_ref     : [rows, 128]  bf16  packed weights (no in-kernel casts)
        # b_ref     : [8, 128]     f32   biases (gate / fc1a / fc1b / fc2)
        # out_ref   : [TB, 128]    f32   lane-dense padded logits
        TB = pooled_ref.shape[1]

        pool_w = w_ref[R.pw:R.pw + IN, 0:IN]
        wih_f = w_ref[R.wih_f:R.wih_f + IN, 0:G]
        wih_b = w_ref[R.wih_b:R.wih_b + IN, 0:G]
        whh = w_ref[R.whh:R.whh + 2 * H, 0:G]
        w1a = w_ref[R.w1a:R.w1a + 2 * H, :]
        w1b = w_ref[R.w1b:R.w1b + 2 * H, :]
        w2a = w_ref[R.w2:R.w2 + LANES, 0:OUT_LANES]
        w2b = w_ref[R.w2 + LANES:R.w2 + 2 * LANES, 0:OUT_LANES]

        # [1, N] bias rows: implicit sublane-broadcast on the add (no materialized
        # broadcast_to -> no vreg blow-up at large TB).
        b_g = b_ref[B_GATE:B_GATE + 1, 0:G]
        b1a = b_ref[B_FC1A:B_FC1A + 1, :]
        b1b = b_ref[B_FC1B:B_FC1B + 1, :]
        b2 = b_ref[B_FC2:B_FC2 + 1, 0:OUT_LANES]

        # Fused surrogate-BERT pooler: dense + tanh per sentence (tiny MXU ops).
        e = [jnp.tanh(jnp.dot(pooled_ref[t], pool_w,
                              preferred_element_type=f32)).astype(bf16)
             for t in range(L)]

        # Fused bidirectional LSTM: h columns [h_fwd | h_bwd]; gate column order
        # [i_f,i_b | f_f,f_b | o_f,o_b | g_f,g_b] -> one wide sigmoid + one tanh.
        h = jnp.zeros((TB, 2 * H), f32)
        c = jnp.zeros((TB, 2 * H), f32)
        for s in range(n_steps):
            gates = (jnp.dot(e[s], wih_f, preferred_element_type=f32)
                     + jnp.dot(e[L - 1 - s], wih_b, preferred_element_type=f32)
                     + b_g)
            if s > 0:   # h == 0 at s == 0; skip the dead recurrent matmul
                gates = gates + jnp.dot(h.astype(bf16), whh,
                                        preferred_element_type=f32)
            sig = jax.nn.sigmoid(gates[:, 0:6 * H])
            g = jnp.tanh(gates[:, 6 * H:8 * H])
            c = sig[:, 2 * H:4 * H] * c + sig[:, 0:2 * H] * g
            h = sig[:, 4 * H:6 * H] * jnp.tanh(c)

        # MLP head in lane-dense 128-wide panels (fc1 zero-padded 192 -> 256).
        h_bf = h.astype(bf16)
        z1a = jnp.maximum(jnp.dot(h_bf, w1a, preferred_element_type=f32) + b1a, 0.0)
        z1b = jnp.maximum(jnp.dot(h_bf, w1b, preferred_element_type=f32) + b1b, 0.0)
        # TODO(synk): nn.Dropout(0.2) is identity at inference; training-mode
        # dropout (pltpu.prng_seed / prng_random_bits) intentionally omitted.
        out_ref[...] = (jnp.dot(z1a.astype(bf16), w2a, preferred_element_type=f32)
                        + jnp.dot(z1b.astype(bf16), w2b, preferred_element_type=f32)
                        + b2)

    return kernel


def network1_forward(pooled_bf16, wslab, bslab, layout, *,
                     input_size, hidden_size, L=3):
    """pooled_bf16: [L, B, input_size] bf16 mean-pooled embeddings -> [B, 3] logits."""
    assert L % 2 == 1, "fused bi-directional stepping assumes odd L (module uses L=3)"
    target = int(np.ceil(L / 2) - 1)
    n_steps = target + 1
    Lr, B, IN = pooled_bf16.shape
    assert Lr == L and IN == input_size

    # Block/grid selection: TB up to 256 fills MXU rows at large B; at moderate B
    # split into >= 2 parallel blocks so v7x's second TensorCore engages; partial
    # batches are rounded up to a multiple of 8 (sublane alignment).
    B8 = _rup(B, 8)
    if 16 <= B8 <= 2 * TB_MAX:
        TB = _rup((B8 + 1) // 2, 8)
    else:
        TB = min(B8, TB_MAX)
    num_blocks = pl.cdiv(B8, TB)
    B_pad = num_blocks * TB
    if B_pad != B:
        pooled_bf16 = jnp.pad(pooled_bf16, ((0, 0), (0, B_pad - B), (0, 0)))

    # Triple-buffer the per-block activation DMA only when the grid is long.
    # The weight/bias slabs have constant (0, 0) block indices, so Pallas fetches
    # them once and never re-DMAs them across grid steps.
    if num_blocks > 2:
        pooled_spec = pl.BlockSpec((L, TB, input_size), lambda i: (0, i, 0),
                                   pipeline_mode=pl.Buffered(3))
    else:
        pooled_spec = pl.BlockSpec((L, TB, input_size), lambda i: (0, i, 0))

    kernel = _make_kernel(layout, L, n_steps, input_size, hidden_size)
    out = pl.pallas_call(
        kernel,
        out_shape=jax.ShapeDtypeStruct((B_pad, OUT_LANES), jnp.float32),
        grid=(num_blocks,),
        in_specs=[
            pooled_spec,
            pl.BlockSpec((layout.rows, layout.lanes), lambda i: (0, 0)),
            pl.BlockSpec((BIAS_ROWS, layout.lanes), lambda i: (0, 0)),
        ],
        out_specs=pl.BlockSpec((TB, OUT_LANES), lambda i: (i, 0)),
        compiler_params=pltpu.CompilerParams(dimension_semantics=("parallel",)),
    )(pooled_bf16, wslab, bslab)
    return out[:B, :NUM_CLASSES]           # drop batch + lane padding (free plumbing)


# --------------------------- parameters / packing -------------------------- #

def init_params(key, input_size, hidden_size):
    ks = jax.random.split(key, 12)
    H = hidden_size

    def w(k, shape, scale=0.1):
        return scale * jax.random.normal(k, shape, dtype=jnp.float32)

    # LSTM weights stored transposed vs PyTorch ([in, 4H]); gate order i,f,g,o;
    # bias is the combined b_ih + b_hh.
    return dict(
        wih_f=w(ks[0], (input_size, 4 * H)), whh_f=w(ks[1], (H, 4 * H)),
        b_f=w(ks[2], (1, 4 * H)),
        wih_b=w(ks[3], (input_size, 4 * H)), whh_b=w(ks[4], (H, 4 * H)),
        b_b=w(ks[5], (1, 4 * H)),
        w1=w(ks[6], (2 * H, FC1_WIDTH)), b1=w(ks[7], (1, FC1_WIDTH)),
        w2=w(ks[8], (FC1_WIDTH, NUM_CLASSES)), b2=w(ks[9], (1, NUM_CLASSES)),
        # surrogate BERT pooler (stands in for the pretrained encoder)
        emb_table=w(ks[10], (VOCAB, input_size), scale=0.5),
        pool_w=w(ks[11], (input_size, input_size)),
    )


def pack_params(p, input_size, hidden_size):
    """Pack MXU operands into one contiguous bf16 slab + a tiny f32 bias slab."""
    IN, H = input_size, hidden_size
    layout = SlabLayout(IN, H)

    def interleave_gates(w_f, w_b):
        # Per-direction [rows, 4H] (PyTorch gate order i,f,g,o) -> fused [rows, 8H]
        # with columns [i_f,i_b | f_f,f_b | o_f,o_b | g_f,g_b].
        def gsplit(wm):
            return (wm[:, 0:H], wm[:, H:2 * H], wm[:, 2 * H:3 * H], wm[:, 3 * H:4 * H])
        i_f, f_f, g_f, o_f = gsplit(w_f)
        i_b, f_b, g_b, o_b = gsplit(w_b)
        return jnp.concatenate([i_f, i_b, f_f, f_b, o_f, o_b, g_f, g_b], axis=1)

    zI = jnp.zeros((IN, 4 * H), jnp.float32)
    zH = jnp.zeros((H, 4 * H), jnp.float32)
    wih_fs = interleave_gates(p["wih_f"], zI)          # fwd input weights in fused cols
    wih_bs = interleave_gates(zI, p["wih_b"])          # bwd input weights in fused cols
    whh_both = jnp.concatenate(
        [interleave_gates(p["whh_f"], zH), interleave_gates(zH, p["whh_b"])], axis=0)
    b_both = interleave_gates(p["b_f"], p["b_b"])      # [1, 8H]

    w1_pad = jnp.zeros((2 * H, FC1_PAD), jnp.float32).at[:, :FC1_WIDTH].set(p["w1"])
    b1_pad = jnp.zeros((1, FC1_PAD), jnp.float32).at[:, :FC1_WIDTH].set(p["b1"])
    w2_pad = jnp.zeros((FC1_PAD, OUT_LANES), jnp.float32)
    w2_pad = w2_pad.at[:FC1_WIDTH, :NUM_CLASSES].set(p["w2"])
    b2_pad = jnp.zeros((1, OUT_LANES), jnp.float32).at[:, :NUM_CLASSES].set(p["b2"])

    R = layout
    wslab = jnp.zeros((R.rows, R.lanes), jnp.float32)
    wslab = wslab.at[R.pw:R.pw + IN, 0:IN].set(p["pool_w"])
    wslab = wslab.at[R.wih_f:R.wih_f + IN, 0:8 * H].set(wih_fs)
    wslab = wslab.at[R.wih_b:R.wih_b + IN, 0:8 * H].set(wih_bs)
    wslab = wslab.at[R.whh:R.whh + 2 * H, 0:8 * H].set(whh_both)
    wslab = wslab.at[R.w1a:R.w1a + 2 * H, :].set(w1_pad[:, 0:LANES])
    wslab = wslab.at[R.w1b:R.w1b + 2 * H, :].set(w1_pad[:, LANES:2 * LANES])
    wslab = wslab.at[R.w2:R.w2 + FC1_PAD, 0:OUT_LANES].set(w2_pad)
    wslab = wslab.astype(jnp.bfloat16)                 # bf16 slab: half the DMA bytes

    bslab = jnp.zeros((BIAS_ROWS, R.lanes), jnp.float32)
    bslab = bslab.at[B_GATE, 0:8 * H].set(b_both[0])
    bslab = bslab.at[B_FC1A, 0:LANES].set(b1_pad[0, 0:LANES])
    bslab = bslab.at[B_FC1B, 0:LANES].set(b1_pad[0, LANES:2 * LANES])
    bslab = bslab.at[B_FC2, 0:OUT_LANES].set(b2_pad[0])
    return wslab, bslab, layout


# ------------------------------- reference --------------------------------- #

def reference_forward(pooled, p, hidden_size):
    """Pure-JAX reference of the same math (original unpacked weights, i/f/g/o
    gate order, separate directions) with the same bf16-MXU / f32-accumulate
    numerics as the kernel — validates the host-side packing + fused stepping."""
    L, B, _ = pooled.shape
    H = hidden_size
    target = int(np.ceil(L / 2) - 1)
    bf16, f32 = jnp.bfloat16, jnp.float32

    def dot(a, b):
        return jnp.dot(a.astype(bf16), b.astype(bf16), preferred_element_type=f32)

    e = [jnp.tanh(dot(pooled[t], p["pool_w"])) for t in range(L)]

    def step(x, h, c, wih, whh, b):
        g = dot(x, wih) + dot(h, whh) + b
        i, f = jax.nn.sigmoid(g[:, :H]), jax.nn.sigmoid(g[:, H:2 * H])
        gg, o = jnp.tanh(g[:, 2 * H:3 * H]), jax.nn.sigmoid(g[:, 3 * H:])
        c = f * c + i * gg
        return o * jnp.tanh(c), c

    z = jnp.zeros((B, H), f32)
    h_f, c_f = z, z
    for t in range(target + 1):
        h_f, c_f = step(e[t], h_f, c_f, p["wih_f"], p["whh_f"], p["b_f"])
    h_b, c_b = z, z
    for t in range(L - 1, target - 1, -1):
        h_b, c_b = step(e[t], h_b, c_b, p["wih_b"], p["whh_b"], p["b_b"])
    hcat = jnp.concatenate([h_f, h_b], axis=-1)
    z1 = jnp.maximum(dot(hcat, p["w1"]) + p["b1"], 0.0)
    return dot(z1, p["w2"]) + p["b2"]


# ----------------------------------- main ---------------------------------- #

if __name__ == "__main__":
    B, L, SEQ = 8, 3, 8                 # batch, sentences, tokens per sentence
    INPUT_SIZE, HIDDEN_SIZE = 32, 16

    key = jax.random.PRNGKey(0)
    k_tok, k_par = jax.random.split(key)
    params = init_params(k_par, INPUT_SIZE, HIDDEN_SIZE)
    wslab, bslab, layout = pack_params(params, INPUT_SIZE, HIDDEN_SIZE)

    # x mirrors the PyTorch input: [B, L*SEQ] token ids (torch.tensor_split dim=1).
    x = jax.random.randint(k_tok, (B, L * SEQ), 0, VOCAB, dtype=jnp.int32)

    # Surrogate-BERT: embedding gather + mean pool (stand-in for pooled CLS).
    # The pooler dense + tanh is fused into the Pallas kernel.
    tok = x.reshape(B, L, SEQ)
    pooled = params["emb_table"][tok].mean(axis=2)                 # [B, L, IN] f32
    pooled = jnp.transpose(pooled, (1, 0, 2))                      # [L, B, IN]

    logits = network1_forward(pooled.astype(jnp.bfloat16), wslab, bslab, layout,
                              input_size=INPUT_SIZE, hidden_size=HIDDEN_SIZE, L=L)
    logits = jax.block_until_ready(logits)

    ref = reference_forward(pooled, params, HIDDEN_SIZE)
    assert logits.shape == (B, NUM_CLASSES)
    np.testing.assert_allclose(np.asarray(logits), np.asarray(ref),
                               rtol=5e-3, atol=5e-3)
    print("KERNEL_OK")
</pallas_src>

<mosaic_0001>
module attributes {stable_mosaic.version = 11 : i64} {
  func.func @kernel(%arg0: i32, %arg1: memref<3x8x32xbf16, #tpu.memory_space<vmem>>, %arg2: memref<448x128xbf16, #tpu.memory_space<vmem>>, %arg3: memref<8x128xf32, #tpu.memory_space<vmem>>, %arg4: memref<8x128xf32, #tpu.memory_space<vmem>>) attributes {dimension_semantics = [#tpu.dimension_semantics<parallel>], iteration_bounds = array<i64: 1>, scalar_prefetch = 0 : i64, scratch_operands = 0 : i64, tpu.core_type = #tpu.core_type<tc>, window_params = [{transform_indices = @transform_0, window_bounds = array<i64: 3, 8, 32>}, {pipeline_mode = #tpu.pipeline_mode<synchronous>, transform_indices = @transform_1, window_bounds = array<i64: 448, 128>}, {pipeline_mode = #tpu.pipeline_mode<synchronous>, transform_indices = @transform_2, window_bounds = array<i64: 8, 128>}, {transform_indices = @transform_3, window_bounds = array<i64: 8, 128>}]} {
    %c0 = arith.constant 0 : index
    %c0_0 = arith.constant 0 : index
    %0 = vector.load %arg2[%c0, %c0_0] : memref<448x128xbf16, #tpu.memory_space<vmem>>, vector<32x32xbf16>
    %c32 = arith.constant 32 : index
    %c0_1 = arith.constant 0 : index
    %1 = vector.load %arg2[%c32, %c0_1] : memref<448x128xbf16, #tpu.memory_space<vmem>>, vector<32x128xbf16>
    %c64 = arith.constant 64 : index
    %c0_2 = arith.constant 0 : index
    %2 = vector.load %arg2[%c64, %c0_2] : memref<448x128xbf16, #tpu.memory_space<vmem>>, vector<32x128xbf16>
    %c96 = arith.constant 96 : index
    %c0_3 = arith.constant 0 : index
    %3 = vector.load %arg2[%c96, %c0_3] : memref<448x128xbf16, #tpu.memory_space<vmem>>, vector<32x128xbf16>
    %c128 = arith.constant 128 : index
    %c0_4 = arith.constant 0 : index
    %4 = vector.load %arg2[%c128, %c0_4] : memref<448x128xbf16, #tpu.memory_space<vmem>>, vector<32x128xbf16>
    %c160 = arith.constant 160 : index
    %c0_5 = arith.constant 0 : index
    %5 = vector.load %arg2[%c160, %c0_5] : memref<448x128xbf16, #tpu.memory_space<vmem>>, vector<32x128xbf16>
    %c192 = arith.constant 192 : index
    %c0_6 = arith.constant 0 : index
    %6 = vector.load %arg2[%c192, %c0_6] : memref<448x128xbf16, #tpu.memory_space<vmem>>, vector<128x128xbf16>
    %c320 = arith.constant 320 : index
    %c0_7 = arith.constant 0 : index
    %7 = vector.load %arg2[%c320, %c0_7] : memref<448x128xbf16, #tpu.memory_space<vmem>>, vector<128x128xbf16>
    %c0_8 = arith.constant 0 : index
    %c0_9 = arith.constant 0 : index
    %8 = vector.load %arg3[%c0_8, %c0_9] : memref<8x128xf32, #tpu.memory_space<vmem>>, vector<1x128xf32>
    %c1 = arith.constant 1 : index
    %c0_10 = arith.constant 0 : index
    %9 = vector.load %arg3[%c1, %c0_10] : memref<8x128xf32, #tpu.memory_space<vmem>>, vector<1x128xf32>
    %c2 = arith.constant 2 : index
    %c0_11 = arith.constant 0 : index
    %10 = vector.load %arg3[%c2, %c0_11] : memref<8x128xf32, #tpu.memory_space<vmem>>, vector<1x128xf32>
    %c3 = arith.constant 3 : index
    %c0_12 = arith.constant 0 : index
    %11 = vector.load %arg3[%c3, %c0_12] : memref<8x128xf32, #tpu.memory_space<vmem>>, vector<1x128xf32>
    %c0_13 = arith.constant 0 : index
    %c0_14 = arith.constant 0 : index
    %c0_15 = arith.constant 0 : index
    %12 = vector.load %arg1[%c0_13, %c0_14, %c0_15] : memref<3x8x32xbf16, #tpu.memory_space<vmem>>, vector<1x8x32xbf16>
    %13 = vector.shape_cast %12 : vector<1x8x32xbf16> to vector<8x32xbf16>
    %cst = arith.constant dense<0.000000e+00> : vector<8x32xf32>
    %14 = tpu.matmul %13, %0, %cst {dimension_numbers = #tpu.dot_dimension_numbers<[1], [0], [0], [1], [0, 0, 1, 1], [], []>} : vector<8x32xbf16>, vector<32x32xbf16>, vector<8x32xf32> -> vector<8x32xf32>
    %15 = math.tanh %14 : vector<8x32xf32>
    %16 = arith.truncf %15 : vector<8x32xf32> to vector<8x32xbf16>
    %c1_16 = arith.constant 1 : index
    %c0_17 = arith.constant 0 : index
    %c0_18 = arith.constant 0 : index
    %17 = vector.load %arg1[%c1_16, %c0_17, %c0_18] : memref<3x8x32xbf16, #tpu.memory_space<vmem>>, vector<1x8x32xbf16>
    %18 = vector.shape_cast %17 : vector<1x8x32xbf16> to vector<8x32xbf16>
    %cst_19 = arith.constant dense<0.000000e+00> : vector<8x32xf32>
    %19 = tpu.matmul %18, %0, %cst_19 {dimension_numbers = #tpu.dot_dimension_numbers<[1], [0], [0], [1], [0, 0, 1, 1], [], []>} : vector<8x32xbf16>, vector<32x32xbf16>, vector<8x32xf32> -> vector<8x32xf32>
    %20 = math.tanh %19 : vector<8x32xf32>
    %21 = arith.truncf %20 : vector<8x32xf32> to vector<8x32xbf16>
    %c2_20 = arith.constant 2 : index
    %c0_21 = arith.constant 0 : index
    %c0_22 = arith.constant 0 : index
    %22 = vector.load %arg1[%c2_20, %c0_21, %c0_22] : memref<3x8x32xbf16, #tpu.memory_space<vmem>>, vector<1x8x32xbf16>
    %23 = vector.shape_cast %22 : vector<1x8x32xbf16> to vector<8x32xbf16>
    %cst_23 = arith.constant dense<0.000000e+00> : vector<8x32xf32>
    %24 = tpu.matmul %23, %0, %cst_23 {dimension_numbers = #tpu.dot_dimension_numbers<[1], [0], [0], [1], [0, 0, 1, 1], [], []>} : vector<8x32xbf16>, vector<32x32xbf16>, vector<8x32xf32> -> vector<8x32xf32>
    %25 = math.tanh %24 : vector<8x32xf32>
    %26 = arith.truncf %25 : vector<8x32xf32> to vector<8x32xbf16>
    %cst_24 = arith.constant 0.000000e+00 : f32
    %27 = vector.broadcast %cst_24 : f32 to vector<8x32xf32>
    %cst_25 = arith.constant dense<0.000000e+00> : vector<8x128xf32>
    %28 = tpu.matmul %16, %1, %cst_25 {dimension_numbers = #tpu.dot_dimension_numbers<[1], [0], [0], [1], [0, 0, 1, 1], [], []>} : vector<8x32xbf16>, vector<32x128xbf16>, vector<8x128xf32> -> vector<8x128xf32>
    %cst_26 = arith.constant dense<0.000000e+00> : vector<8x128xf32>
    %29 = tpu.matmul %26, %2, %cst_26 {dimension_numbers = #tpu.dot_dimension_numbers<[1], [0], [0], [1], [0, 0, 1, 1], [], []>} : vector<8x32xbf16>, vector<32x128xbf16>, vector<8x128xf32> -> vector<8x128xf32>
    %30 = arith.addf %28, %29 : vector<8x128xf32>
    %31 = vector.broadcast %8 : vector<1x128xf32> to vector<8x128xf32>
    %32 = arith.addf %30, %31 : vector<8x128xf32>
    %33 = vector.extract_strided_slice %32 {offsets = [0, 0], sizes = [8, 96], strides = [1, 1]} : vector<8x128xf32> to vector<8x96xf32>
    %34 = arith.negf %33 : vector<8x96xf32>
    %35 = math.exp %34 : vector<8x96xf32>
    %cst_27 = arith.constant 1.000000e+00 : f32
    %36 = vector.broadcast %cst_27 : f32 to vector<8x96xf32>
    %37 = arith.addf %36, %35 : vector<8x96xf32>
    %38 = arith.divf %36, %37 : vector<8x96xf32>
    %39 = vector.extract_strided_slice %32 {offsets = [0, 96], sizes = [8, 32], strides = [1, 1]} : vector<8x128xf32> to vector<8x32xf32>
    %40 = math.tanh %39 : vector<8x32xf32>
    %41 = vector.extract_strided_slice %38 {offsets = [0, 32], sizes = [8, 32], strides = [1, 1]} : vector<8x96xf32> to vector<8x32xf32>
    %42 = arith.mulf %41, %27 : vector<8x32xf32>
    %43 = vector.extract_strided_slice %38 {offsets = [0, 0], sizes = [8, 32], strides = [1, 1]} : vector<8x96xf32> to vector<8x32xf32>
    %44 = arith.mulf %43, %40 : vector<8x32xf32>
    %45 = arith.addf %42, %44 : vector<8x32xf32>
    %46 = vector.extract_strided_slice %38 {offsets = [0, 64], sizes = [8, 32], strides = [1, 1]} : vector<8x96xf32> to vector<8x32xf32>
    %47 = math.tanh %45 : vector<8x32xf32>
    %48 = arith.mulf %46, %47 : vector<8x32xf32>
    %cst_28 = arith.constant dense<0.000000e+00> : vector<8x128xf32>
    %49 = tpu.matmul %21, %1, %cst_28 {dimension_numbers = #tpu.dot_dimension_numbers<[1], [0], [0], [1], [0, 0, 1, 1], [], []>} : vector<8x32xbf16>, vector<32x128xbf16>, vector<8x128xf32> -> vector<8x128xf32>
    %cst_29 = arith.constant dense<0.000000e+00> : vector<8x128xf32>
    %50 = tpu.matmul %21, %2, %cst_29 {dimension_numbers = #tpu.dot_dimension_numbers<[1], [0], [0], [1], [0, 0, 1, 1], [], []>} : vector<8x32xbf16>, vector<32x128xbf16>, vector<8x128xf32> -> vector<8x128xf32>
    %51 = arith.addf %49, %50 : vector<8x128xf32>
    %52 = vector.broadcast %8 : vector<1x128xf32> to vector<8x128xf32>
    %53 = arith.addf %51, %52 : vector<8x128xf32>
    %54 = arith.truncf %48 : vector<8x32xf32> to vector<8x32xbf16>
    %cst_30 = arith.constant dense<0.000000e+00> : vector<8x128xf32>
    %55 = tpu.matmul %54, %3, %cst_30 {dimension_numbers = #tpu.dot_dimension_numbers<[1], [0], [0], [1], [0, 0, 1, 1], [], []>} : vector<8x32xbf16>, vector<32x128xbf16>, vector<8x128xf32> -> vector<8x128xf32>
    %56 = arith.addf %53, %55 : vector<8x128xf32>
    %57 = vector.extract_strided_slice %56 {offsets = [0, 0], sizes = [8, 96], strides = [1, 1]} : vector<8x128xf32> to vector<8x96xf32>
    %58 = arith.negf %57 : vector<8x96xf32>
    %59 = math.exp %58 : vector<8x96xf32>
    %cst_31 = arith.constant 1.000000e+00 : f32
    %60 = vector.broadcast %cst_31 : f32 to vector<8x96xf32>
    %61 = arith.addf %60, %59 : vector<8x96xf32>
    %62 = arith.divf %60, %61 : vector<8x96xf32>
    %63 = vector.extract_strided_slice %56 {offsets = [0, 96], sizes = [8, 32], strides = [1, 1]} : vector<8x128xf32> to vector<8x32xf32>
    %64 = math.tanh %63 : vector<8x32xf32>
    %65 = vector.extract_strided_slice %62 {offsets = [0, 32], sizes = [8, 32], strides = [1, 1]} : vector<8x96xf32> to vector<8x32xf32>
    %66 = arith.mulf %65, %45 : vector<8x32xf32>
    %67 = vector.extract_strided_slice %62 {offsets = [0, 0], sizes = [8, 32], strides = [1, 1]} : vector<8x96xf32> to vector<8x32xf32>
    %68 = arith.mulf %67, %64 : vector<8x32xf32>
    %69 = arith.addf %66, %68 : vector<8x32xf32>
    %70 = vector.extract_strided_slice %62 {offsets = [0, 64], sizes = [8, 32], strides = [1, 1]} : vector<8x96xf32> to vector<8x32xf32>
    %71 = math.tanh %69 : vector<8x32xf32>
    %72 = arith.mulf %70, %71 : vector<8x32xf32>
    %73 = arith.truncf %72 : vector<8x32xf32> to vector<8x32xbf16>
    %cst_32 = arith.constant dense<0.000000e+00> : vector<8x128xf32>
    %74 = tpu.matmul %73, %4, %cst_32 {dimension_numbers = #tpu.dot_dimension_numbers<[1], [0], [0], [1], [0, 0, 1, 1], [], []>} : vector<8x32xbf16>, vector<32x128xbf16>, vector<8x128xf32> -> vector<8x128xf32>
    %75 = vector.broadcast %9 : vector<1x128xf32> to vector<8x128xf32>
    %76 = arith.addf %74, %75 : vector<8x128xf32>
    %cst_33 = arith.constant 0.000000e+00 : f32
    %77 = vector.broadcast %cst_33 : f32 to vector<8x128xf32>
    %78 = arith.maximumf %76, %77 : vector<8x128xf32>
    %cst_34 = arith.constant dense<0.000000e+00> : vector<8x128xf32>
    %79 = tpu.matmul %73, %5, %cst_34 {dimension_numbers = #tpu.dot_dimension_numbers<[1], [0], [0], [1], [0, 0, 1, 1], [], []>} : vector<8x32xbf16>, vector<32x128xbf16>, vector<8x128xf32> -> vector<8x128xf32>
    %80 = vector.broadcast %10 : vector<1x128xf32> to vector<8x128xf32>
    %81 = arith.addf %79, %80 : vector<8x128xf32>
    %cst_35 = arith.constant 0.000000e+00 : f32
    %82 = vector.broadcast %cst_35 : f32 to vector<8x128xf32>
    %83 = arith.maximumf %81, %82 : vector<8x128xf32>
    %84 = arith.truncf %78 : vector<8x128xf32> to vector<8x128xbf16>
    %cst_36 = arith.constant dense<0.000000e+00> : vector<8x128xf32>
    %85 = tpu.matmul %84, %6, %cst_36 {dimension_numbers = #tpu.dot_dimension_numbers<[1], [0], [0], [1], [0, 0, 1, 1], [], []>} : vector<8x128xbf16>, vector<128x128xbf16>, vector<8x128xf32> -> vector<8x128xf32>
    %86 = arith.truncf %83 : vector<8x128xf32> to vector<8x128xbf16>
    %cst_37 = arith.constant dense<0.000000e+00> : vector<8x128xf32>
    %87 = tpu.matmul %86, %7, %cst_37 {dimension_numbers = #tpu.dot_dimension_numbers<[1], [0], [0], [1], [0, 0, 1, 1], [], []>} : vector<8x128xbf16>, vector<128x128xbf16>, vector<8x128xf32> -> vector<8x128xf32>
    %88 = arith.addf %85, %87 : vector<8x128xf32>
    %89 = vector.broadcast %11 : vector<1x128xf32> to vector<8x128xf32>
    %90 = arith.addf %88, %89 : vector<8x128xf32>
    %c0_38 = arith.constant 0 : index
    %c0_39 = arith.constant 0 : index
    %91 = vector.load %arg4[%c0_38, %c0_39] : memref<8x128xf32, #tpu.memory_space<vmem>>, vector<8x128xf32>
    tpu.vector_store %arg4[%c0_38, %c0_39], %90 {strides = array<i32>} : memref<8x128xf32, #tpu.memory_space<vmem>>, vector<8x128xf32>,
    return
  }
  func.func @transform_0(%arg0: i32) -> (i32, i32, i32) {
    %c0_i32 = arith.constant 0 : i32
    %c0_i32_0 = arith.constant 0 : i32
    %c0_i32_1 = arith.constant 0 : i32
    return %c0_i32, %arg0, %c0_i32_0 : i32, i32, i32
  }
  func.func @transform_1(%arg0: i32) -> (i32, i32) {
    %c0_i32 = arith.constant 0 : i32
    %c0_i32_0 = arith.constant 0 : i32
    %c0_i32_1 = arith.constant 0 : i32
    return %c0_i32, %c0_i32_0 : i32, i32
  }
  func.func @transform_2(%arg0: i32) -> (i32, i32) {
    %c0_i32 = arith.constant 0 : i32
    %c0_i32_0 = arith.constant 0 : i32
    %c0_i32_1 = arith.constant 0 : i32
    return %c0_i32, %c0_i32_0 : i32, i32
  }
  func.func @transform_3(%arg0: i32) -> (i32, i32) {
    %c0_i32 = arith.constant 0 : i32
    %c0_i32_0 = arith.constant 0 : i32
    return %arg0, %c0_i32 : i32, i32
  }
}

</mosaic_0001>

<bundles_post_ra>
// kernel: tpu_custom_call.1
= control target key start
LH: loop header
LB: loop body
LE: loop exit
PB: predicated region body
PF: predicated region fallthrough
CT: control target
= control target key end

     0   :  { %8 = vsyncpa [#allocation3], 0  ;;  %s1436_s0 = inlined_call_operand.hbm [shape: bf16[3,8,32], index: 0, kind: input, shape index: {}]   ;;  %s1437_s1 = inlined_call_operand.hbm [shape: bf16[448,128], index: 1, kind: input, shape index: {}]   ;;  %s1438_s2 = inlined_call_operand.hbm [shape: f32[8,128], index: 2, kind: input, shape index: {}]   ;;  %s1439_s3 = inlined_call_operand.hbm [shape: f32[8,128], index: 3, kind: output, shape index: {}]  }
   0x1   :  { %9 = vsyncpa [#allocation6], 0 }
   0x2   :  { %10 = vsyncpa [#allocation4], 0  ;;  %s1270_s12 = smov [#allocation5]   ;;  %s1271_s14 = smov [#allocation2]  }
   0x3   :  { %s28_s13 = sshll.u32 %s1270_s12, 4  ;;  %s16_s15 = sshll.u32 %s1271_s14, 4  ;;  %s29_s13 = int_to_ptr.vmem [resolvable:$true] %s28_s13  ;;  %s1299_s15 = int_to_ptr.vmem [resolvable:$true] %s16_s15 }
   0x4   :  { %s1176_s18 = scalar_lea.hbm %s1437_s1, 3584 }
   0x5   :  { %p1177_p0 = scmp.ne.s32.totalorder %s1437_s1, %s1176_s18  ;;  %p1180_p1 = scmp.lt.u32.totalorder %s1176_s18, %s1437_s1 }
   0x7   :  { %p1182_p2 = pnand %p1180_p1, %p1177_p0 }
   0x9   :  { %1185 = shalt.err (!%p1182_p2)
}
   0xa   :  { %s1186_s23 = scalar_lea.vmem %s29_s13, 3584  ;;  %p1191_p4 = scmp.lt.s32.totalorder %s29_s13, %s29_s13 }
   0xb   :  { %p1187_p3 = scmp.ne.s32.totalorder %s29_s13, %s1186_s23  ;;  %p1192_p5 = scmp.lt.s32.totalorder %s1186_s23, %s1186_s23 }
   0xd   :  { %p1193_p6 = por %p1192_p5, %p1191_p4 }
   0xf   :  { %p1194_p7 = pnand %p1193_p6, %p1187_p3 }
  0x11   :  { %1197 = shalt.err (!%p1194_p7)
}
  0x12   :  { %s1272_s24 = smov 64   ;;  %s1273_s25 = smov 4  }
  0x13   :  { %34 = dma.hbm_to_vmem [thread:$0]  %s1437_s1, 3584, %s29_s13, [#allocation6], %s1272_s24, %s1272_s24, %s1273_s25  }
  0x14   :  { %s1198_s30 = scalar_lea.hbm %s1436_s0, 192 }
  0x15   :  { %p1199_p8 = scmp.ne.s32.totalorder %s1436_s0, %s1198_s30  ;;  %p1202_p9 = scmp.lt.u32.totalorder %s1198_s30, %s1436_s0 }
  0x17   :  { %p1204_p10 = pnand %p1202_p9, %p1199_p8 }
  0x19   :  { %1207 = shalt.err (!%p1204_p10)
}
  0x1a   :  { %s1208_s8 = scalar_lea.vmem %s1299_s15, 192  ;;  %p1213_p12 = scmp.lt.s32.totalorder %s1299_s15, %s1299_s15 }
  0x1b   :  { %p1209_p11 = scmp.ne.s32.totalorder %s1299_s15, %s1208_s8  ;;  %p1214_p13 = scmp.lt.s32.totalorder %s1208_s8, %s1208_s8 }
  0x1d   :  { %p1215_p0 = por %p1214_p13, %p1213_p12 }
  0x1f   :  { %p1216_p1 = pnand %p1215_p0, %p1209_p11 }
  0x21   :  { %1219 = shalt.err (!%p1216_p1)
}
  0x22   :  { %22 = dma.hbm_to_vmem [thread:$0]  %s1436_s0, 192, %s1299_s15, [#allocation3], %s1272_s24, %s1272_s24, %s1273_s25  }
  0x23   :  { %s1274_s10 = smov [#allocation7]   ;;  %s1220_s14 = scalar_lea.hbm %s1438_s2, 128 }
  0x24   :  { %s41_s11 = sshll.u32 %s1274_s10, 4  ;;  %p1221_p2 = scmp.ne.s32.totalorder %s1438_s2, %s1220_s14  ;;  %s42_s11 = int_to_ptr.vmem [resolvable:$true] %s41_s11 }
  0x25   :  { %p1224_p3 = scmp.lt.u32.totalorder %s1220_s14, %s1438_s2 }
  0x27   :  { %p1226_p4 = pnand %p1224_p3, %p1221_p2 }
  0x29   :  { %1229 = shalt.err (!%p1226_p4)
}
  0x2a   :  { %s1230_s20 = scalar_lea.vmem %s42_s11, 128  ;;  %p1235_p6 = scmp.lt.s32.totalorder %s42_s11, %s42_s11 }
  0x2b   :  { %p1231_p5 = scmp.ne.s32.totalorder %s42_s11, %s1230_s20  ;;  %p1236_p7 = scmp.lt.s32.totalorder %s1230_s20, %s1230_s20 }
  0x2d   :  { %p1237_p8 = por %p1236_p7, %p1235_p6 }
  0x2f   :  { %p1238_p9 = pnand %p1237_p8, %p1231_p5 }
  0x31   :  { %1241 = shalt.err (!%p1238_p9)
}
  0x32   :  { %44 = dma.hbm_to_vmem [thread:$0]  %s1438_s2, 128, %s42_s11, [#allocation6]  }
  0x33   :  { %1264 = dma.done.wait [#allocation3], 192  }
  0x34   :  { %1265 = vsyncadd [#allocation3], 4294967104 }
  0x35   :  { %1266 = dma.done.wait [#allocation6], 3712  }
  0x36   :  { %1267 = vsyncadd [#allocation6], 4294963584  ;;  %v1275_v0 = vmov 0.0   ;;  %vm1276_vm0 = vmmov 0   ;;  %v1126_v1 = vld [vmem:[#allocation5] sm:$0xff]   ;;  %v1127_v2 = vld [vmem:[#allocation5 + $0x8] sm:$0xff]  }
  0x37   :  { %988 = vmatprep.subr.bf16.mxu0 %v1275_v0  ;;  %992 = vmatprep.mubr.msk.bf16.mxu0 %vm1276_vm0, %v1275_v0  ;;  %vm128_vm1 = vcmask 261120   ;;  %v115_v3 = vld [vmem:[#allocation2] sm:$0xf]  ;;  %v222_v4 = vld [vmem:[#allocation2 + $0x8] sm:$0xf]  ;;  %v1130_v8 = vld [vmem:[#allocation5 + $0x20] sm:$0xff]  }
  0x38   :  { %996 = vmatprep.subr.bf16.mxu1 %v1275_v0  ;;  %1000 = vmatprep.mubr.msk.bf16.mxu1 %vm1276_vm0, %v1275_v0  ;;  %v175_v5 = vld [vmem:[#allocation2 + $0x4] sm:$0xf]  ;;  %v1128_v6 = vld [vmem:[#allocation5 + $0x10] sm:$0xff]   ;;  %v1131_v9 = vld [vmem:[#allocation5 + $0x28] sm:$0xff]   ;;  %s1277_s2 = smov 32   ;;  %s1278_s21 = smov [#allocation8]  }
  0x39   :  { %989 = vmatpush3.bf16.msra.mxu0 %v1126_v1  ;;  %997 = vmatpush3.bf16.msra.mxu1 %v1126_v1  ;;  %v1129_v7 = vld [vmem:[#allocation5 + $0x18] sm:$0xff]   ;;  %v907_v32 = vld [vmem:[#allocation7] ss:$0 sm:$0xff]  ;;  %v1132_v49 = vld [vmem:[#allocation5 + $0x30] sm:$0xff]   ;;  %s886_s22 = sshll.u32 %s1278_s21, 4  ;;  %s887_s22 = int_to_ptr.vmem [resolvable:$true] %s886_s22 }
  0x3a   :  { %990 = vmatprep.subr.bf16.mxu0 %v1275_v0  ;;  %998 = vmatprep.subr.bf16.mxu1 %v1275_v0  ;;  %v1133_v50 = vld [vmem:[#allocation5 + $0x38] sm:$0xff]   ;;  %s1242_s23 = scalar_lea.vmem %s887_s22, 128  ;;  %p1247_p11 = scmp.lt.s32.totalorder %s887_s22, %s887_s22 }
  0x3b   :  { %p1243_p10 = scmp.ne.s32.totalorder %s887_s22, %s1242_s23  ;;  %p1248_p12 = scmp.lt.s32.totalorder %s1242_s23, %s1242_s23 }
  0x3d   :  { %991 = vmatpush3.bf16.msra.mxu0 %v1127_v2  ;;  %999 = vmatpush3.bf16.msra.mxu1 %v1127_v2  ;;  %p1249_p13 = por %p1248_p12, %p1247_p11 }
  0x3e   :  { %1004 = vmatprep.subr.bf16.mxu0 %v1275_v0  ;;  %1012 = vmatprep.subr.bf16.mxu1 %v1275_v0 }
  0x3f   :  { %p1250_p0 = pnand %p1249_p13, %p1243_p10 }
  0x40   :  { %993 = vmatmul.mubr.msk.bf16.vlgmr.msra.gmra.mrb[0].mxu0 %vm128_vm1, %v115_v3  ;;  %1001 = vmatmul.mubr.msk.bf16.vlgmr.msra.gmra.mrb[0].mxu1 %vm128_vm1, %v175_v5 }
  0x41   :  { %1005 = vmatpush3.bf16.msra.mxu0 %v1126_v1  ;;  %1008 = vmatprep.mubr.msk.bf16.mxu0 %vm1276_vm0, %v1275_v0 }
  0x42   :  { %1006 = vmatprep.subr.bf16.mxu0 %v1275_v0  ;;  %1016 = vmatprep.mubr.msk.bf16.mxu1 %vm1276_vm0, %v1275_v0 }
  0x43   :  { %1013 = vmatpush3.bf16.msra.mxu1 %v1130_v8 }
  0x44   :  { %1014 = vmatprep.subr.bf16.mxu1 %v1275_v0 }
  0x45   :  { %1007 = vmatpush3.bf16.msra.mxu0 %v1127_v2 }
  0x46   :  { %1020 = vmatprep.subr.bf16.mxu0 %v1275_v0 }
  0x47   :  { %1015 = vmatpush3.bf16.msra.mxu1 %v1131_v9 }
  0x48   :  { %1009 = vmatmul.mubr.msk.bf16.vlgmr.msra.gmra.mrb[4].mxu0 %vm128_vm1, %v222_v4  ;;  %1028 = vmatprep.subr.bf16.mxu1 %v1275_v0 }
  0x49   :  { %1024 = vmatprep.mubr.msk.bf16.mxu0 %vm1276_vm0, %v1275_v0  ;;  %1021 = vmatpush3.bf16.msra.mxu0 %v1128_v6 }
  0x4a   :  { %1022 = vmatprep.subr.bf16.mxu0 %v1275_v0 }
  0x4d   :  { %1023 = vmatpush3.bf16.msra.mxu0 %v1129_v7 }
  0x4e   :  { %1052 = vmatprep.subr.bf16.mxu0 %v1275_v0 }
 0x113   :  { %v166_v10 = vpop.f32.mrb[0].mxu0  ;;  %v213_v22 = vpop.f32.mrb[0].mxu1 }
 0x114   :  { %1154 = vtanh.f32 %v166_v10  ;;  %v994_v11 = vpop.f32.mrb[1].mxu0  ;;  %v1002_v23 = vpop.f32.mrb[1].mxu1 }
 0x115   :  { %v169_v12 = vpop.f32.mrb[2].mxu0  ;;  %v216_v24 = vpop.f32.mrb[2].mxu1  ;;  %v1140_v23 = vld [vmem:[#allocation5 + $0xa0] sm:$0xff]  }
 0x116   :  { %v995_v13 = vpop.f32.mrb[3].mxu0  ;;  %v1003_v25 = vpop.f32.mrb[3].mxu1  ;;  %v1138_v12 = vld [vmem:[#allocation5 + $0x60] sm:$0xff]   ;;  %v1142_v24 = vld [vmem:[#allocation5 + $0xa8] sm:$0xff]  }
 0x117   :  { %v1144_v25 = vld [vmem:[#allocation5 + $0xb0] sm:$0xff]  }
 0x11b   :  { %v260_v14 = vpop.f32.mrb[4].mxu0 }
 0x11c   :  { %1156 = vtanh.f32 %v260_v14  ;;  %v1010_v15 = vpop.f32.mrb[5].mxu0  ;;  %v1139_v14 = vld [vmem:[#allocation5 + $0x68] sm:$0xff]  }
 0x11d   :  { %v263_v16 = vpop.f32.mrb[6].mxu0  ;;  %1158 = vtanh.f32 %v213_v22  ;;  %v1137_v22 = vld [vmem:[#allocation5 + $0x58] sm:$0xff]  }
 0x11e   :  { %v1155_v17 = vpop.eup %1154  ;;  %v1011_v18 = vpop.f32.mrb[7].mxu0  ;;  %v1141_v16 = vld [vmem:[#allocation5 + $0x70] sm:$0xff]  }
 0x11f   :  { %v173_v19 = vpack.c.bf16 %v1155_v17, %v1155_v17  ;;  %v1143_v17 = vld [vmem:[#allocation5 + $0x78] sm:$0xff]   ;;  %v1145_v18 = vld [vmem:[#allocation5 + $0x80] sm:$0xff]  }
 0x121   :  { %1025 = vmatmul.mubr.msk.bf16.vlgmr.msra.gmra.mrb[8].mxu0 %vm128_vm1, %v173_v19  ;;  %v1147_v19 = vld [vmem:[#allocation5 + $0x88] sm:$0xff]  }
 0x122   :  { %1056 = vmatprep.mubr.msk.bf16.mxu0 %vm1276_vm0, %v1275_v0 }
 0x126   :  { %v1157_v20 = vpop.eup %1156 }
 0x127   :  { %v267_v21 = vpack.c.bf16 %v1157_v20, %v1157_v20  ;;  %v1159_v26 = vpop.eup %1158  ;;  %v1136_v20 = vld [vmem:[#allocation5 + $0x50] sm:$0xff]  }
 0x128   :  { %v220_v27 = vpack.c.bf16 %v1159_v26, %v1159_v26  ;;  %v1146_v26 = vld [vmem:[#allocation5 + $0xb8] sm:$0xff]  }
 0x129   :  { %1017 = vmatmul.mubr.msk.bf16.vlgmr.msra.gmra.mrb[4].mxu1 %vm128_vm1, %v267_v21 }
 0x12a   :  { %1029 = vmatpush3.bf16.msra.mxu1 %v1130_v8  ;;  %1032 = vmatprep.mubr.msk.bf16.mxu1 %vm1276_vm0, %v1275_v0  ;;  %v1134_v8 = vld [vmem:[#allocation5 + $0x40] sm:$0xff]  }
 0x12b   :  { %1030 = vmatprep.subr.bf16.mxu1 %v1275_v0  ;;  %1053 = vmatpush3.bf16.msra.mxu0 %v1134_v8 }
 0x12c   :  { %1054 = vmatprep.subr.bf16.mxu0 %v1275_v0 }
 0x12e   :  { %1031 = vmatpush3.bf16.msra.mxu1 %v1131_v9  ;;  %v1135_v9 = vld [vmem:[#allocation5 + $0x48] sm:$0xff]  }
 0x12f   :  { %1036 = vmatprep.subr.bf16.mxu1 %v1275_v0  ;;  %1055 = vmatpush3.bf16.msra.mxu0 %v1135_v9 }
 0x130   :  { %1060 = vmatprep.subr.bf16.mxu0 %v1275_v0 }
 0x131   :  { %1033 = vmatmul.mubr.msk.bf16.vlgmr.msra.gmra.mrb[8].mxu1 %vm128_vm1, %v220_v27 }
 0x132   :  { %1037 = vmatpush3.bf16.msra.mxu1 %v1128_v6  ;;  %1040 = vmatprep.mubr.msk.bf16.mxu1 %vm1276_vm0, %v1275_v0 }
 0x133   :  { %1038 = vmatprep.subr.bf16.mxu1 %v1275_v0 }
 0x136   :  { %1039 = vmatpush3.bf16.msra.mxu1 %v1129_v7 }
 0x137   :  { %1044 = vmatprep.subr.bf16.mxu1 %v1275_v0 }
 0x13d   :  { %1041 = vmatmul.mubr.msk.bf16.vlgmr.msra.gmra.mrb[8].mxu1 %vm128_vm1, %v220_v27  ;;  %v1148_v27 = vld [vmem:[#allocation5 + $0xc0] sm:$0xff]  }
 0x13e   :  { %1048 = vmatprep.mubr.msk.bf16.mxu1 %vm1276_vm0, %v1275_v0  ;;  %1045 = vmatpush3.bf16.msra.mxu1 %v1132_v49 }
 0x13f   :  { %1046 = vmatprep.subr.bf16.mxu1 %v1275_v0 }
 0x142   :  { %1047 = vmatpush3.bf16.msra.mxu1 %v1133_v50 }
 0x143   :  { %1088 = vmatprep.subr.bf16.mxu1 %v1275_v0 }
 0x1f4   :  { %v372_v28 = vpop.f32.mrb[8].mxu0 }
 0x1f5   :  { %v1026_v29 = vpop.f32.mrb[9].mxu0 }
 0x1f6   :  { %v375_v30 = vpop.f32.mrb[10].mxu0  ;;  %v1150_v29 = vld [vmem:[#allocation5 + $0xc8] sm:$0xff]  }
 0x1f7   :  { %v1027_v31 = vpop.f32.mrb[11].mxu0  ;;  %v1151_v30 = vld [vmem:[#allocation5 + $0x98] sm:$0xff]  }
 0x1f8   :  { %v1152_v31 = vld [vmem:[#allocation5 + $0xd0] sm:$0xff]  }
 0x1fc   :  { %v317_v33 = vpop.f32.mrb[4].mxu1 }
 0x1fd   :  { %v373_v34 = vadd.f32 %v372_v28, %v317_v33  ;;  %v1018_v35 = vpop.f32.mrb[5].mxu1  ;;  %v1149_v28 = vld [vmem:[#allocation5 + $0x90] sm:$0xff]   ;;  %v915_v33 = vld [vmem:[#allocation7 + $0x1] ss:$0 sm:$0xff] }
 0x1fe   :  { %v320_v36 = vpop.f32.mrb[6].mxu1 }
 0x1ff   :  { %v382_v37 = vadd.f32 %v907_v32, %v373_v34  ;;  %v1019_v38 = vpop.f32.mrb[7].mxu1 }
 0x201   :  { %1160 = vtanh.f32 %v382_v37  ;;  %v908_v40 = vmul.f32 -1.442695, %v382_v37 }
 0x203   :  { %1162 = vpow2.f32 %v908_v40 }
 0x20b   :  { %v1161_v39 = vpop.eup %1160 }
 0x20c   :  { %392 = vrot.lane.b32.xlu0 %v1161_v39, %s1277_s2 }
 0x20d   :  { %v1163_v41 = vpop.eup %1162 }
 0x20e   :  { %v386_v42 = vadd.f32 1.0, %v1163_v41  ;;  %v919_v41 = vld [vmem:[#allocation7 + $0x2] ss:$0 sm:$0xff] }
 0x210   :  { %1164 = vrcp.f32 %v386_v42 }
 0x21a   :  { %v1165_v43 = vpop.eup %1164 }
 0x21b   :  { %v390_v46 = vmul.f32 0.0, %v1165_v43 }
 0x27e   :  { %v393_v44 = vpop.permute.xlu0 %392 }
 0x27f   :  { %v395_v45 = vmul.f32 %v1165_v43, %v393_v44 }
 0x281   :  { %397 = vrot.lane.b32.xlu0 %v395_v45, %s1277_s2 }
 0x2f3   :  { %v398_v47 = vpop.permute.xlu0 %397 }
 0x2f4   :  { %v400_v48 = vadd.f32 %v398_v47, %v390_v46 }
 0x2f6   :  { %1166 = vtanh.f32 %v400_v48 }
 0x300   :  { %v1167_v51 = vpop.eup %1166 }
 0x301   :  { %403 = vrot.lane.b32.xlu1 %v1167_v51, %s1277_s2 }
 0x373   :  { %v404_v52 = vpop.permute.xlu1 %403 }
 0x374   :  { %v406_v53 = vmul.f32 %v1165_v43, %v404_v52  ;;  %v939_v52 = vld [vmem:[#allocation7 + $0x3] ss:$0 sm:$0xff] }
 0x376   :  { %v491_v54 = vpack.c.bf16 %v406_v53, %v406_v53 }
 0x378   :  { %493 = vrot.lane.b32.xlu1 %v491_v54, %s1272_s24 }
 0x3ea   :  { %v494_v55 = vpop.permute.xlu1 %493 }
 0x3eb   :  { %1049 = vmatmul.mubr.msk.bf16.vlgmr.msra.gmra.mrb[8].mxu1 %vm128_vm1, %v494_v55 }
 0x3ec   :  { %1104 = vmatprep.mubr.msk.bf16.mxu1 %vm1276_vm0, %v1275_v0  ;;  %1089 = vmatpush3.bf16.msra.mxu1 %v1138_v12 }
 0x3ed   :  { %1090 = vmatprep.subr.bf16.mxu1 %v1275_v0 }
 0x3f0   :  { %1091 = vmatpush3.bf16.msra.mxu1 %v1139_v14 }
 0x3f1   :  { %1092 = vmatprep.subr.bf16.mxu1 %v1275_v0 }
 0x3f4   :  { %1093 = vmatpush3.bf16.msra.mxu1 %v1141_v16 }
 0x3f5   :  { %1094 = vmatprep.subr.bf16.mxu1 %v1275_v0 }
 0x3f8   :  { %1095 = vmatpush3.bf16.msra.mxu1 %v1143_v17 }
 0x3f9   :  { %1096 = vmatprep.subr.bf16.mxu1 %v1275_v0 }
 0x3fc   :  { %1097 = vmatpush3.bf16.msra.mxu1 %v1145_v18 }
 0x3fd   :  { %1098 = vmatprep.subr.bf16.mxu1 %v1275_v0 }
 0x400   :  { %1099 = vmatpush3.bf16.msra.mxu1 %v1147_v19 }
 0x401   :  { %1100 = vmatprep.subr.bf16.mxu1 %v1275_v0 }
 0x404   :  { %1101 = vmatpush3.bf16.msra.mxu1 %v1149_v28 }
 0x405   :  { %1102 = vmatprep.subr.bf16.mxu1 %v1275_v0 }
 0x408   :  { %1103 = vmatpush3.bf16.msra.mxu1 %v1151_v30 }
 0x4be   :  { %v544_v56 = vpop.f32.mrb[8].mxu1 }
 0x4bf   :  { %v1108_v57 = vadd.f32 %v907_v32, %v544_v56  ;;  %v1050_v58 = vpop.f32.mrb[9].mxu1  ;;  %v1153_v32 = vld [vmem:[#allocation5 + $0xd8] sm:$0xff]  }
 0x4c0   :  { %v547_v59 = vpop.f32.mrb[10].mxu1 }
 0x4c1   :  { %1168 = vtanh.f32 %v1108_v57  ;;  %v1051_v60 = vpop.f32.mrb[11].mxu1  ;;  %v914_v62 = vmul.f32 -1.442695, %v1108_v57 }
 0x4c3   :  { %1170 = vpow2.f32 %v914_v62 }
 0x4cb   :  { %v1169_v61 = vpop.eup %1168 }
 0x4cc   :  { %560 = vrot.lane.b32.xlu0 %v1169_v61, %s1277_s2 }
 0x4cd   :  { %v1171_v63 = vpop.eup %1170 }
 0x4ce   :  { %v554_v1 = vadd.f32 1.0, %v1171_v63 }
 0x4d0   :  { %1172 = vrcp.f32 %v554_v1 }
 0x4da   :  { %v1173_v2 = vpop.eup %1172 }
 0x4db   :  { %v558_v5 = vmul.f32 %v1173_v2, %v400_v48 }
 0x53e   :  { %v561_v3 = vpop.permute.xlu0 %560 }
 0x53f   :  { %v563_v4 = vmul.f32 %v1173_v2, %v561_v3 }
 0x541   :  { %565 = vrot.lane.b32.xlu1 %v563_v4, %s1277_s2 }
 0x5b3   :  { %v566_v6 = vpop.permute.xlu1 %565 }
 0x5b4   :  { %v568_v7 = vadd.f32 %v566_v6, %v558_v5 }
 0x5b6   :  { %1174 = vtanh.f32 %v568_v7 }
 0x5c0   :  { %v1175_v10 = vpop.eup %1174 }
 0x5c1   :  { %571 = vrot.lane.b32.xlu0 %v1175_v10, %s1277_s2 }
 0x633   :  { %v572_v11 = vpop.permute.xlu0 %571 }
 0x634   :  { %v574_v13 = vmul.f32 %v1173_v2, %v572_v11 }
 0x636   :  { %v575_v15 = vpack.c.bf16 %v574_v13, %v574_v13 }
 0x638   :  { %581 = vrot.lane.b32.xlu1 %v575_v15, %s1272_s24 }
 0x6aa   :  { %v582_v21 = vpop.permute.xlu1 %581 }
 0x6ab   :  { %1057 = vmatmul.mubr.msk.bf16.vlgmr.msra.gmra.mrb[12].mxu0 %vm128_vm1, %v582_v21 }
 0x6ac   :  { %1061 = vmatpush3.bf16.msra.mxu0 %v1136_v20  ;;  %1064 = vmatprep.mubr.msk.bf16.mxu0 %vm1276_vm0, %v1275_v0 }
 0x6ad   :  { %1062 = vmatprep.subr.bf16.mxu0 %v1275_v0 }
 0x6b0   :  { %1063 = vmatpush3.bf16.msra.mxu0 %v1137_v22 }
 0x6b1   :  { %1068 = vmatprep.subr.bf16.mxu0 %v1275_v0 }
 0x6b3   :  { %1065 = vmatmul.mubr.msk.bf16.vlgmr.msra.gmra.mrb[16].mxu0 %vm128_vm1, %v582_v21 }
 0x6b4   :  { %1069 = vmatpush3.bf16.msra.mxu0 %v1140_v23  ;;  %1084 = vmatprep.mubr.msk.bf16.mxu0 %vm1276_vm0, %v1275_v0 }
 0x6b5   :  { %1070 = vmatprep.subr.bf16.mxu0 %v1275_v0 }
 0x6b8   :  { %1071 = vmatpush3.bf16.msra.mxu0 %v1142_v24 }
 0x6b9   :  { %1072 = vmatprep.subr.bf16.mxu0 %v1275_v0 }
 0x6bc   :  { %1073 = vmatpush3.bf16.msra.mxu0 %v1144_v25 }
 0x6bd   :  { %1074 = vmatprep.subr.bf16.mxu0 %v1275_v0 }
 0x6c0   :  { %1075 = vmatpush3.bf16.msra.mxu0 %v1146_v26 }
 0x6c1   :  { %1076 = vmatprep.subr.bf16.mxu0 %v1275_v0 }
 0x6c4   :  { %1077 = vmatpush3.bf16.msra.mxu0 %v1148_v27 }
 0x6c5   :  { %1078 = vmatprep.subr.bf16.mxu0 %v1275_v0 }
 0x6c8   :  { %1079 = vmatpush3.bf16.msra.mxu0 %v1150_v29 }
 0x6c9   :  { %1080 = vmatprep.subr.bf16.mxu0 %v1275_v0 }
 0x6cc   :  { %1081 = vmatpush3.bf16.msra.mxu0 %v1152_v31 }
 0x6cd   :  { %1082 = vmatprep.subr.bf16.mxu0 %v1275_v0 }
 0x6d0   :  { %1083 = vmatpush3.bf16.msra.mxu0 %v1153_v32 }
 0x77e   :  { %v632_v34 = vpop.f32.mrb[12].mxu0 }
 0x77f   :  { %v633_v35 = vadd.f32 %v915_v33, %v632_v34  ;;  %v1058_v36 = vpop.f32.mrb[13].mxu0 }
 0x780   :  { %v635_v37 = vpop.f32.mrb[14].mxu0 }
 0x781   :  { %v638_v38 = vmax.f32 %v633_v35, 0.0  ;;  %v1059_v39 = vpop.f32.mrb[15].mxu0 }
 0x783   :  { %v696_v40 = vpack.c.bf16 %v638_v38, %v638_v38 }
 0x785   :  { %1105 = vmatmul.mubr.bf16.vlgmr.msra.gmra.mrb[12].mxu1 %v696_v40 }
 0x786   :  { %v689_v42 = vpop.f32.mrb[16].mxu0 }
 0x787   :  { %v690_v43 = vadd.f32 %v919_v41, %v689_v42  ;;  %v1066_v44 = vpop.f32.mrb[17].mxu0 }
 0x788   :  { %v692_v45 = vpop.f32.mrb[18].mxu0 }
 0x789   :  { %v695_v46 = vmax.f32 %v690_v43, 0.0  ;;  %v1067_v47 = vpop.f32.mrb[19].mxu0 }
 0x78b   :  { %v697_v48 = vpack.c.bf16 %v695_v46, %v695_v46 }
 0x78d   :  { %1085 = vmatmul.mubr.bf16.vlgmr.msra.gmra.mrb[20].mxu0 %v697_v48 }
 0x858   :  { %v868_v0 = vpop.f32.mrb[12].mxu1 }
 0x859   :  { %v1106_v49 = vpop.f32.mrb[13].mxu1 }
 0x85a   :  { %v871_v50 = vpop.f32.mrb[14].mxu1 }
 0x85b   :  { %v1107_v51 = vpop.f32.mrb[15].mxu1 }
 0x860   :  { %v780_v53 = vpop.f32.mrb[20].mxu0 }
 0x861   :  { %v869_v54 = vadd.f32 %v868_v0, %v780_v53  ;;  %v1086_v55 = vpop.f32.mrb[21].mxu0 }
 0x862   :  { %v783_v56 = vpop.f32.mrb[22].mxu0 }
 0x863   :  { %v878_v57 = vadd.f32 %v939_v52, %v869_v54  ;;  %v1087_v58 = vpop.f32.mrb[23].mxu0 }
 0x865   :  { %879 = vst [vmem:[#allocation8] sm:$0xff] %v878_v57 }
 0x866   :  { %1253 = shalt.err (!%p1250_p0)
}
 0x867   :  { %s1254_s26 = scalar_lea.hbm %s1439_s3, 128 }
 0x868   :  { %p1255_p1 = scmp.ne.s32.totalorder %s1439_s3, %s1254_s26  ;;  %p1258_p2 = scmp.lt.u32.totalorder %s1254_s26, %s1439_s3 }
 0x86a   :  { %p1260_p3 = pnand %p1258_p2, %p1255_p1 }
 0x86c   :  { %1263 = shalt.err (!%p1260_p3)
}
 0x86d   :  { %889 = dma.vmem_to_hbm [thread:$0]  %s887_s22, 128, %s1439_s3, [#allocation4]  }
 0x86e   :  { %1268 = dma.done.wait [#allocation4], 128  }
 0x86f   :  { %1269 = vsyncadd [#allocation4], 4294967168 }
 0x870   :  { %893 = vsyncpa [#allocation3], 1 }
 0x871   :  { %894 = vsyncpa [#allocation6], 1 }
 0x872   :  { %895 = vsyncpa [#allocation4], 1 }

</bundles_post_ra>
